<compile_context>
chip_gen: v5e
topology: v5e:2x2
jax: 0.10.0
libtpu: 0.0.40
codegen_flags: <defaults>
</compile_context>

<pallas_src>
import jax
import jax.numpy as jnp
from jax import lax
from jax.experimental import pallas as pl
from jax.experimental.pallas import tpu as pltpu

_LANE = 128
_SUBLANE = 8


def _round_up(x, m):
    return ((x + m - 1) // m) * m


def _gemm_bias_relu_kernel(w_ref, b_ref, p_ref, o_ref):
    """One lane-dense output block of the transposed conv GEMM + bias + ReLU.

    w_ref: (Cout, Kp)  packed weights (Kp = KH*KW*Cin rounded to sublane mult)
    b_ref: (Cout, 1)   bias, broadcast over lanes
    p_ref: (Kp, TM)    transposed im2col patches for this block of M
    o_ref: (Cout, TM)  lane-dense output block
    """
    acc = jnp.dot(w_ref[...], p_ref[...], preferred_element_type=jnp.float32)
    o_ref[...] = jnp.maximum(acc + b_ref[...], 0.0).astype(o_ref.dtype)


def pack_conv_params(w_oihw, b):
    """Pack Conv2d parameters once (hoisted out of the per-forward path).

    Contraction order is (kh, kw, cin) with cin fastest, matching the patch
    matrix built in remote_conv_forward.
    """
    Cout, Cin, KH, KW = w_oihw.shape
    K = KH * KW * Cin
    Kp = _round_up(K, _SUBLANE)
    w_ck = jnp.transpose(w_oihw, (0, 2, 3, 1)).reshape(Cout, K)   # (co, kh, kw, ci)
    w_packed = jnp.pad(w_ck.astype(jnp.float32), ((0, 0), (0, Kp - K)))
    b_packed = b.reshape(Cout, 1).astype(jnp.float32)
    return w_packed, b_packed


def remote_conv_forward(x_nchw, w_packed, b_packed, *, kh=3, kw=3, padding=1):
    """Pallas forward for RemoteBaseCUDARPC(underlying=Conv2d(3x3)+ReLU).

    x_nchw:   (N, Cin, H, W) float32
    w_packed: (Cout, Kp)     from pack_conv_params
    b_packed: (Cout, 1)      from pack_conv_params
    returns   (N, Cout, Ho, Wo) float32
    """
    N, Cin, H, W = x_nchw.shape
    Cout, Kp = w_packed.shape
    K = kh * kw * Cin
    assert Kp == _round_up(K, _SUBLANE), "packed weights do not match x channels"

    Ho = H + 2 * padding - kh + 1
    Wo = W + 2 * padding - kw + 1
    M = N * Ho * Wo

    # ---- wrapper-side im2col, TRANSPOSED: contraction on sublanes, M on lanes ----
    x_p = jnp.pad(x_nchw, ((0, 0), (0, 0), (padding, padding), (padding, padding)))
    taps = [x_p[:, :, i:i + Ho, j:j + Wo] for i in range(kh) for j in range(kw)]
    p = jnp.stack(taps, axis=0)               # (kh*kw, N, Cin, Ho, Wo)
    p = jnp.transpose(p, (0, 2, 1, 3, 4))     # (kh*kw, Cin, N, Ho, Wo)
    p = p.reshape(K, M)                       # rows: (kh,kw,ci); cols: (n,ho,wo)

    TM = min(2048, _round_up(M, _LANE))       # lane-dense output blocks
    Mp = _round_up(M, TM)
    p_pad = jnp.pad(p, ((0, Kp - K), (0, Mp - M)))

    grid = (Mp // TM,)
    out_p = pl.pallas_call(
        _gemm_bias_relu_kernel,
        out_shape=jax.ShapeDtypeStruct((Cout, Mp), jnp.float32),
        grid_spec=pltpu.PrefetchScalarGridSpec(
            num_scalar_prefetch=0,
            grid=grid,
            in_specs=[
                pl.BlockSpec((Cout, Kp), lambda i: (0, 0)),   # weights (whole)
                pl.BlockSpec((Cout, 1), lambda i: (0, 0)),    # bias (whole)
                pl.BlockSpec((Kp, TM), lambda i: (0, i)),     # patch block
            ],
            out_specs=pl.BlockSpec((Cout, TM), lambda i: (0, i)),
        ),
        compiler_params=pltpu.CompilerParams(
            dimension_semantics=("parallel",)),
        cost_estimate=pl.CostEstimate(
            flops=2 * M * K * Cout,
            transcendentals=0,
            bytes_accessed=4 * (Cout * Kp + Cout + Kp * Mp + Cout * Mp)),
    )(w_packed, b_packed, p_pad)

    # Unpack: drop padded M columns, back to the PyTorch NCHW convention.
    out = out_p[:, :M].reshape(Cout, N, Ho, Wo)
    return jnp.transpose(out, (1, 0, 2, 3))


def _reference(x_nchw, w_oihw, b, *, padding=1):
    out = lax.conv_general_dilated(
        x_nchw, w_oihw, window_strides=(1, 1),
        padding=((padding, padding), (padding, padding)),
        dimension_numbers=("NCHW", "OIHW", "NCHW"))
    out = out + b.reshape(1, -1, 1, 1)
    return jnp.maximum(out, 0.0)


if __name__ == "__main__":
    key = jax.random.PRNGKey(0)
    k1, k2, k3 = jax.random.split(key, 3)

    N, Cin, H, W = 2, 4, 16, 16
    Cout, KH, KW = 8, 3, 3

    x = jax.random.normal(k1, (N, Cin, H, W), dtype=jnp.float32)
    fan_in = Cin * KH * KW
    w = jax.random.normal(k2, (Cout, Cin, KH, KW), dtype=jnp.float32) / jnp.sqrt(fan_in)
    b = jax.random.normal(k3, (Cout,), dtype=jnp.float32) * 0.01

    # Parameters are packed once, outside the per-forward jitted path.
    w_packed, b_packed = pack_conv_params(w, b)

    fwd = jax.jit(remote_conv_forward)          # fuses the im2col / unpack glue
    out = jax.block_until_ready(fwd(x, w_packed, b_packed))

    ref = jax.block_until_ready(_reference(x, w, b))
    assert out.shape == (N, Cout, H, W)
    assert jnp.allclose(out, ref, atol=1e-4, rtol=1e-4), "mismatch vs JAX conv reference"

    print("KERNEL_OK")
</pallas_src>

<mosaic_0001>
module attributes {stable_mosaic.version = 11 : i64} {
  func.func @_gemm_bias_relu_kernel(%arg0: i32, %arg1: memref<8x40xf32, #tpu.memory_space<vmem>>, %arg2: memref<8x1xf32, #tpu.memory_space<vmem>>, %arg3: memref<40x512xf32, #tpu.memory_space<vmem>>, %arg4: memref<8x512xf32, #tpu.memory_space<vmem>>) attributes {dimension_semantics = [#tpu.dimension_semantics<parallel>], iteration_bounds = array<i64: 1>, scalar_prefetch = 0 : i64, scratch_operands = 0 : i64, tpu.core_type = #tpu.core_type<tc>, window_params = [{pipeline_mode = #tpu.pipeline_mode<synchronous>, transform_indices = @transform_0, window_bounds = array<i64: 8, 40>}, {pipeline_mode = #tpu.pipeline_mode<synchronous>, transform_indices = @transform_1, window_bounds = array<i64: 8, 1>}, {transform_indices = @transform_2, window_bounds = array<i64: 40, 512>}, {transform_indices = @transform_3, window_bounds = array<i64: 8, 512>}]} {
    %c0 = arith.constant 0 : index
    %c0_0 = arith.constant 0 : index
    %0 = vector.load %arg1[%c0, %c0_0] : memref<8x40xf32, #tpu.memory_space<vmem>>, vector<8x40xf32>
    %c0_1 = arith.constant 0 : index
    %c0_2 = arith.constant 0 : index
    %1 = vector.load %arg3[%c0_1, %c0_2] : memref<40x512xf32, #tpu.memory_space<vmem>>, vector<40x512xf32>
    %cst = arith.constant dense<0.000000e+00> : vector<8x512xf32>
    %2 = tpu.matmul %0, %1, %cst {dimension_numbers = #tpu.dot_dimension_numbers<[1], [0], [0], [1], [0, 0, 1, 1], [], []>} : vector<8x40xf32>, vector<40x512xf32>, vector<8x512xf32> -> vector<8x512xf32>
    %c0_3 = arith.constant 0 : index
    %c0_4 = arith.constant 0 : index
    %3 = vector.load %arg2[%c0_3, %c0_4] : memref<8x1xf32, #tpu.memory_space<vmem>>, vector<8x1xf32>
    %4 = vector.broadcast %3 : vector<8x1xf32> to vector<8x512xf32>
    %5 = arith.addf %2, %4 : vector<8x512xf32>
    %cst_5 = arith.constant 0.000000e+00 : f32
    %6 = vector.broadcast %cst_5 : f32 to vector<8x512xf32>
    %7 = arith.maximumf %5, %6 : vector<8x512xf32>
    %c0_6 = arith.constant 0 : index
    %c0_7 = arith.constant 0 : index
    %8 = vector.load %arg4[%c0_6, %c0_7] : memref<8x512xf32, #tpu.memory_space<vmem>>, vector<8x512xf32>
    tpu.vector_store %arg4[%c0_6, %c0_7], %7 {strides = array<i32>} : memref<8x512xf32, #tpu.memory_space<vmem>>, vector<8x512xf32>,
    return
  }
  func.func @transform_0(%arg0: i32) -> (i32, i32) {
    %c0_i32 = arith.constant 0 : i32
    %c0_i32_0 = arith.constant 0 : i32
    %c0_i32_1 = arith.constant 0 : i32
    return %c0_i32, %c0_i32_0 : i32, i32
  }
  func.func @transform_1(%arg0: i32) -> (i32, i32) {
    %c0_i32 = arith.constant 0 : i32
    %c0_i32_0 = arith.constant 0 : i32
    %c0_i32_1 = arith.constant 0 : i32
    return %c0_i32, %c0_i32_0 : i32, i32
  }
  func.func @transform_2(%arg0: i32) -> (i32, i32) {
    %c0_i32 = arith.constant 0 : i32
    %c0_i32_0 = arith.constant 0 : i32
    return %c0_i32, %arg0 : i32, i32
  }
  func.func @transform_3(%arg0: i32) -> (i32, i32) {
    %c0_i32 = arith.constant 0 : i32
    %c0_i32_0 = arith.constant 0 : i32
    return %c0_i32, %arg0 : i32, i32
  }
}

</mosaic_0001>

<bundles_post_ra>
// kernel: remote_conv_forward.1
= control target key start
LH: loop header
LB: loop body
LE: loop exit
PB: predicated region body
PF: predicated region fallthrough
CT: control target
= control target key end

     0   :  { %v143_v3 = vmov 0   ;;  %vm41_vm0 = vcmask 326656   ;;  %s246_s2 = inlined_call_operand.vmem [shape: f32[40,512], index: 2, kind: input, shape index: {}]   ;;  %s247_s0 = inlined_call_operand.vmem [shape: f32[8,40], index: 0, kind: input, shape index: {}]   ;;  %s248_s1 = inlined_call_operand.vmem [shape: f32[8,1], index: 1, kind: input, shape index: {}]   ;;  %s249_s3 = inlined_call_operand.vmem [shape: f32[8,512], index: 3, kind: output, shape index: {}]  }
   0x1   :  { %v33_v0 = vld [vmem:[%s246_s2 + $0x90] sm:$0xff]  ;;  %v34_v1 = vld [vmem:[%s246_s2 + $0x98] sm:$0xff]  ;;  %142 = vset.pattern.permute.xlu0 %v143_v3  ;;  %v31_v7 = vld [vmem:[%s246_s2 + $0x80] sm:$0xff] }
   0x2   :  { %v29_v2 = vld [vmem:[%s246_s2 + $0x70] sm:$0xff]  ;;  %96 = vmatpush.msra.mxu2 %v33_v0  ;;  %116 = vmatpush.msra.mxu3 %v34_v1  ;;  %v30_v4 = vld [vmem:[%s246_s2 + $0x78] sm:$0xff]  ;;  %v32_v8 = vld [vmem:[%s246_s2 + $0x88] sm:$0xff] }
   0x3   :  { %v25_v5 = vld [vmem:[%s246_s2 + $0x50] sm:$0xff]  ;;  %v26_v6 = vld [vmem:[%s246_s2 + $0x58] sm:$0xff]  ;;  %v27_v9 = vld [vmem:[%s246_s2 + $0x60] sm:$0xff]  ;;  %56 = vmatpush.msra.mxu0 %v31_v7  ;;  %76 = vmatpush.msra.mxu1 %v32_v8 }
   0x4   :  { %97 = vmatpush.msra.mxu2 %v29_v2  ;;  %117 = vmatpush.msra.mxu3 %v30_v4  ;;  %v28_v10 = vld [vmem:[%s246_s2 + $0x68] sm:$0xff]  ;;  %v21_v11 = vld [vmem:[%s246_s2 + $0x30] sm:$0xff]  ;;  %v22_v12 = vld [vmem:[%s246_s2 + $0x38] sm:$0xff] }
   0x5   :  { %v23_v13 = vld [vmem:[%s246_s2 + $0x40] sm:$0xff]  ;;  %v24_v14 = vld [vmem:[%s246_s2 + $0x48] sm:$0xff]  ;;  %57 = vmatpush.msra.mxu0 %v27_v9  ;;  %77 = vmatpush.msra.mxu1 %v28_v10  ;;  %v17_v15 = vld [vmem:[%s246_s2 + $0x10] sm:$0xff] }
   0x6   :  { %98 = vmatpush.msra.mxu2 %v25_v5  ;;  %118 = vmatpush.msra.mxu3 %v26_v6  ;;  %v18_v16 = vld [vmem:[%s246_s2 + $0x18] sm:$0xff]  ;;  %v14_v17 = vld [vmem:[%s247_s0] sm:$0xff]  ;;  %v20_v19 = vld [vmem:[%s246_s2 + $0x28] sm:$0xff] }
   0x7   :  { %58 = vmatpush.msra.mxu0 %v23_v13  ;;  %78 = vmatpush.msra.mxu1 %v24_v14  ;;  %v19_v18 = vld [vmem:[%s246_s2 + $0x20] sm:$0xff]  ;;  %v16_v22 = vld [vmem:[%s246_s2 + $0x8] sm:$0xff] }
   0x8   :  { %99 = vmatpush.msra.mxu2 %v21_v11  ;;  %119 = vmatpush.msra.mxu3 %v22_v12  ;;  %v35_v20 = vld [vmem:[%s248_s1] sm:$0xff] }
   0x9   :  { %v15_v21 = vld [vmem:[%s246_s2] sm:$0xff]  ;;  %59 = vmatpush.msra.mxu0 %v19_v18  ;;  %79 = vmatpush.msra.mxu1 %v20_v19 }
   0xa   :  { %100 = vmatpush.msra.mxu2 %v17_v15  ;;  %120 = vmatpush.msra.mxu3 %v18_v16 }
   0xb   :  { %139 = vmatmul.msk.f32.vlgmr.msra.gmra.mxu2 %vm41_vm0, %v14_v17  ;;  %140 = vmatmul.msk.f32.vlgmr.msra.gmra.mxu3 %vm41_vm0, %v14_v17 }
   0xc   :  { %38 = vperm.xlu0 %142, %v35_v20   ;;  %60 = vmatpush.msra.mxu0 %v15_v21 }
   0xd   :  { %80 = vmatpush.msra.mxu1 %v16_v22  ;;  %137 = vmatmul.msk.f32.vlgmr.msra.gmra.mxu0 %vm41_vm0, %v14_v17 }
   0xe   :  { %138 = vmatmul.msk.f32.vlgmr.msra.gmra.mxu1 %vm41_vm0, %v14_v17 }
  0x7e   :  { %v39_v23 = vpop.permute.xlu0 %38 }
  0x8a   :  { %v62_v24 = vpop.f32.mrf.mxu0 }
  0x8b   :  { %v82_v25 = vpop.f32.mrf.mxu1  ;;  %v63_v26 = vadd.f32 %v62_v24, %v39_v23 }
  0x8c   :  { %v83_v27 = vadd.f32 %v82_v25, %v39_v23 }
  0x8d   :  { %v125_v30 = vmax.f32 %v63_v26, 0.0 }
  0x8e   :  { %v102_v28 = vpop.f32.mrf.mxu2  ;;  %v122_v29 = vpop.f32.mrf.mxu3  ;;  %v126_v31 = vmax.f32 %v83_v27, 0.0 }
  0x8f   :  { %v103_v32 = vadd.f32 %v102_v28, %v39_v23  ;;  %v123_v33 = vadd.f32 %v122_v29, %v39_v23  ;;  %129 = vst [vmem:[%s249_s3] sm:$0xff] %v125_v30 }
  0x90   :  { %130 = vst [vmem:[%s249_s3 + $0x8] sm:$0xff] %v126_v31 }
  0x91   :  { %v127_v34 = vmax.f32 %v103_v32, 0.0  ;;  %v128_v35 = vmax.f32 %v123_v33, 0.0 }
  0x93   :  { %131 = vst [vmem:[%s249_s3 + $0x10] sm:$0xff] %v127_v34 }
  0x94   :  { %132 = vst [vmem:[%s249_s3 + $0x18] sm:$0xff] %v128_v35 }

</bundles_post_ra>
